<compile_context>
chip_gen: v6e
topology: v6e:2x2x1
jax: 0.10.0
libtpu: 0.0.40
codegen_flags: <defaults>
</compile_context>

<pallas_src>
import jax
import jax.numpy as jnp
from jax.experimental import pallas as pl
from jax.experimental.pallas import tpu as pltpu


# ----------------------------- Pallas kernels ------------------------------

def project_kernel(x_ref, w_ref, o_ref):
    """h0 = x @ W1_0  (reassociated first Linear of layer 0)."""
    o_ref[...] = jnp.dot(
        x_ref[...], w_ref[...], preferred_element_type=jnp.float32
    ).astype(o_ref.dtype)


def gin_conv_kernel(a_ref, h_ref, b1_ref, w2_ref, b2_ref, t_ref, wn_ref,
                    o_ref, acc_ref):
    """One GINConv layer (reassociated), tiled over (row tiles, k tiles).

    acc = sum_k A'[i,k] @ h[k]          (h = x @ W1, A' = A + I)
    epilogue:  z  = relu(acc + b1)
               z  = relu(z @ W2_folded + b2_folded) + t      (BN folded)
               out = z @ W1_next        (identity for last layer)
    """
    k = pl.program_id(1)

    @pl.when(k == 0)
    def _():
        acc_ref[...] = jnp.zeros_like(acc_ref)

    acc_ref[...] += jnp.dot(
        a_ref[...], h_ref[...], preferred_element_type=jnp.float32)

    @pl.when(k == pl.num_programs(1) - 1)
    def _():
        z = jnp.maximum(acc_ref[...] + b1_ref[...], 0.0)
        z = jnp.maximum(
            jnp.dot(z.astype(jnp.bfloat16), w2_ref[...],
                    preferred_element_type=jnp.float32) + b2_ref[...], 0.0)
        z = z + t_ref[...]
        o_ref[...] = jnp.dot(
            z.astype(jnp.bfloat16), wn_ref[...],
            preferred_element_type=jnp.float32).astype(o_ref.dtype)


def readout_kernel(p_ref, x_ref, lw1_ref, lb1_ref, lw2_ref, lb2_ref,
                   o_ref, acc_ref):
    """global_add_pool (tiled over N) -> ReLU(lin1) -> lin2 (lane-padded)."""
    k = pl.program_id(0)

    @pl.when(k == 0)
    def _():
        acc_ref[...] = jnp.zeros_like(acc_ref)

    acc_ref[...] += jnp.dot(
        p_ref[...], x_ref[...], preferred_element_type=jnp.float32)

    @pl.when(k == pl.num_programs(0) - 1)
    def _():
        z = jnp.maximum(
            jnp.dot(acc_ref[...].astype(jnp.bfloat16), lw1_ref[...],
                    preferred_element_type=jnp.float32) + lb1_ref[...], 0.0)
        # TODO(synk): F.dropout(p=0.5) is identity in eval mode; training-mode
        # dropout is not implemented.
        o_ref[...] = jnp.dot(
            z.astype(jnp.bfloat16), lw2_ref[...],
            preferred_element_type=jnp.float32) + lb2_ref[...]


# ------------------------------- wrappers -----------------------------------

_VMEM_LIMIT = 32 * 1024 * 1024  # explicit, comfortably above tile needs


def project(x, w, *, tm, hpad):
    n, f = x.shape
    return pl.pallas_call(
        project_kernel,
        out_shape=jax.ShapeDtypeStruct((n, hpad), jnp.bfloat16),
        grid_spec=pltpu.PrefetchScalarGridSpec(
            num_scalar_prefetch=0,
            grid=(n // tm,),
            in_specs=[
                pl.BlockSpec((tm, f), lambda i: (i, 0)),
                pl.BlockSpec((f, hpad), lambda i: (0, 0)),
            ],
            out_specs=pl.BlockSpec((tm, hpad), lambda i: (i, 0)),
        ),
        compiler_params=pltpu.CompilerParams(
            dimension_semantics=("parallel",),
            vmem_limit_bytes=_VMEM_LIMIT),
    )(x, w)


def gin_conv(adj, h, b1, w2f, b2f, t, wnext, *, tm, tk, hpad):
    n = adj.shape[0]
    return pl.pallas_call(
        gin_conv_kernel,
        out_shape=jax.ShapeDtypeStruct((n, hpad), jnp.bfloat16),
        grid_spec=pltpu.PrefetchScalarGridSpec(
            num_scalar_prefetch=0,
            grid=(n // tm, n // tk),
            in_specs=[
                pl.BlockSpec((tm, tk), lambda i, k: (i, k)),       # A' tile
                pl.BlockSpec((tk, hpad), lambda i, k: (k, 0)),     # h tile
                pl.BlockSpec((1, hpad), lambda i, k: (0, 0)),      # b1
                pl.BlockSpec((hpad, hpad), lambda i, k: (0, 0)),   # W2 folded
                pl.BlockSpec((1, hpad), lambda i, k: (0, 0)),      # b2 folded
                pl.BlockSpec((1, hpad), lambda i, k: (0, 0)),      # BN shift
                pl.BlockSpec((hpad, hpad), lambda i, k: (0, 0)),   # W1 of next
            ],
            out_specs=pl.BlockSpec((tm, hpad), lambda i, k: (i, 0)),
            scratch_shapes=[pltpu.VMEM((tm, hpad), jnp.float32)],
        ),
        compiler_params=pltpu.CompilerParams(
            dimension_semantics=("parallel", "arbitrary"),
            vmem_limit_bytes=_VMEM_LIMIT),
    )(adj, h, b1, w2f, b2f, t, wnext)


def readout(pool, h, lw1, lb1, lw2, lb2, *, tk, gpad, hpad):
    n = h.shape[0]
    return pl.pallas_call(
        readout_kernel,
        out_shape=jax.ShapeDtypeStruct((gpad, hpad), jnp.float32),
        grid_spec=pltpu.PrefetchScalarGridSpec(
            num_scalar_prefetch=0,
            grid=(n // tk,),
            in_specs=[
                pl.BlockSpec((gpad, tk), lambda k: (0, k)),        # P tile
                pl.BlockSpec((tk, hpad), lambda k: (k, 0)),        # x tile
                pl.BlockSpec((hpad, hpad), lambda k: (0, 0)),      # lin1 W
                pl.BlockSpec((1, hpad), lambda k: (0, 0)),         # lin1 b
                pl.BlockSpec((hpad, hpad), lambda k: (0, 0)),      # lin2 W (padded)
                pl.BlockSpec((1, hpad), lambda k: (0, 0)),         # lin2 b (padded)
            ],
            out_specs=pl.BlockSpec((gpad, hpad), lambda k: (0, 0)),
            scratch_shapes=[pltpu.VMEM((gpad, hpad), jnp.float32)],
        ),
        compiler_params=pltpu.CompilerParams(
            dimension_semantics=("arbitrary",),
            vmem_limit_bytes=_VMEM_LIMIT),
    )(pool, h, lw1, lb1, lw2, lb2)


# ----------------------------- parameter prep -------------------------------

def _linear_init(key, fan_in, fan_out):
    """Deterministic PyTorch-style Linear init (uniform +-1/sqrt(fan_in))."""
    k_w, k_b = jax.random.split(key)
    bound = 1.0 / jnp.sqrt(jnp.float32(fan_in))
    w = jax.random.uniform(k_w, (fan_in, fan_out), jnp.float32, -bound, bound)
    b = jax.random.uniform(k_b, (fan_out,), jnp.float32, -bound, bound)
    return w, b


def _pad_w(w, rows, cols):
    return jnp.zeros((rows, cols), jnp.float32).at[:w.shape[0], :w.shape[1]].set(w)


def _pad_v(v, cols):
    return jnp.zeros((1, cols), jnp.float32).at[0, :v.shape[0]].set(v)


def prepare_gin0_params(key, num_layers, hidden, in_dim, hpad, fpad):
    bn_eps = 1e-5
    raw = []
    for layer in range(num_layers):
        key, k1, k2 = jax.random.split(key, 3)
        fan_in = in_dim if layer == 0 else hidden
        w1, b1 = _linear_init(k1, fan_in, hidden)
        w2, b2 = _linear_init(k2, hidden, hidden)
        # BatchNorm1d eval-mode defaults: gamma=1, beta=0, mean=0, var=1.
        # NOTE: for real checkpoints this fold requires bn scale > 0 elementwise
        # (ReLU precedes BN); it holds here.
        s = jnp.ones((hidden,), jnp.float32) / jnp.sqrt(1.0 + bn_eps)
        t = jnp.zeros((hidden,), jnp.float32) - 0.0 * s
        raw.append((w1, b1, w2 * s[None, :], b2 * s, t))

    key, k1, k2 = jax.random.split(key, 3)
    lw1, lb1 = _linear_init(k1, hidden, hidden)
    lw2, lb2 = _linear_init(k2, hidden, 1)

    # First-layer input projection weight, padded [fpad, hpad].
    proj_w = _pad_w(raw[0][0], fpad, hpad).astype(jnp.bfloat16)

    conv_params = []
    for layer in range(num_layers):
        _, b1, w2f, b2f, t = raw[layer]
        if layer + 1 < num_layers:
            wnext = _pad_w(raw[layer + 1][0], hpad, hpad)   # fuse next W1
        else:
            wnext = jnp.eye(hpad, dtype=jnp.float32)        # last layer: identity
        conv_params.append((
            _pad_v(b1, hpad),
            _pad_w(w2f, hpad, hpad).astype(jnp.bfloat16),
            _pad_v(b2f, hpad),
            _pad_v(t, hpad),
            wnext.astype(jnp.bfloat16),
        ))

    head_params = (
        _pad_w(lw1, hpad, hpad).astype(jnp.bfloat16),
        _pad_v(lb1, hpad),
        _pad_w(lw2, hpad, hpad).astype(jnp.bfloat16),   # only column 0 is real
        _pad_v(lb2, hpad),
    )
    return proj_w, conv_params, head_params


# ------------------------------- full forward --------------------------------

def gin0_forward(x_pad, adj, pool, proj_w, conv_params, head_params,
                 *, num_graphs, tm, tk, hpad, gpad):
    h = project(x_pad, proj_w, tm=tm, hpad=hpad)            # x @ W1 (layer 0)
    for (b1, w2f, b2f, t, wnext) in conv_params:
        h = gin_conv(adj, h, b1, w2f, b2f, t, wnext, tm=tm, tk=tk, hpad=hpad)
    out = readout(pool, h, *head_params, tk=tk, gpad=gpad, hpad=hpad)
    return out[:num_graphs, 0]                              # Flatten: (G,1) -> (G,)


# ---------------------------------- main -------------------------------------

if __name__ == "__main__":
    key = jax.random.PRNGKey(0)

    num_layers = 3
    hidden = 32
    num_nodes = 16
    num_edges = 48
    num_graphs = 2
    in_dim = 2

    # Lane-dense padded sizes and tiles.
    HPAD, FPAD, GPAD = 128, 128, 8
    if num_nodes <= 128:
        NPAD, TM, TK = 128, 128, 128
    else:
        NPAD = ((num_nodes + 511) // 512) * 512
        TM, TK = 512, 512

    # node features: [N, 2]  (GIN0.conv1 expects in_dim = 2)
    key, kx, ke = jax.random.split(key, 3)
    x = jax.random.normal(kx, (num_nodes, in_dim), jnp.float32)

    # random edge_index [2, E] (source row 0, target row 1), PyG convention
    edge_index = jax.random.randint(ke, (2, num_edges), 0, num_nodes, jnp.int32)
    src, dst = edge_index[0], edge_index[1]

    # batch vector [N]: first half graph 0, second half graph 1
    batch = jnp.concatenate([
        jnp.zeros(num_nodes // 2, jnp.int32),
        jnp.ones(num_nodes - num_nodes // 2, jnp.int32),
    ])

    # glue: densify.  A'[i,j] = #edges j->i, plus identity (GIN self term, eps=0).
    adj = jnp.zeros((NPAD, NPAD), jnp.float32)
    adj = adj.at[dst, src].add(1.0)
    adj = adj.at[jnp.arange(num_nodes), jnp.arange(num_nodes)].add(1.0)
    adj = adj.astype(jnp.bfloat16)          # small integer counts exact in bf16

    # one-hot pooling matrix P [GPAD, NPAD] (global_add_pool), zero-padded.
    pool = jnp.zeros((GPAD, NPAD), jnp.float32)
    pool = pool.at[batch, jnp.arange(num_nodes)].set(1.0).astype(jnp.bfloat16)

    # zero-padded node features [NPAD, FPAD].
    x_pad = jnp.zeros((NPAD, FPAD), jnp.float32).at[:num_nodes, :in_dim].set(x)
    x_pad = x_pad.astype(jnp.bfloat16)

    key, kp = jax.random.split(key)
    proj_w, conv_params, head_params = prepare_gin0_params(
        kp, num_layers, hidden, in_dim, HPAD, FPAD)

    out = gin0_forward(x_pad, adj, pool, proj_w, conv_params, head_params,
                       num_graphs=num_graphs, tm=TM, tk=TK, hpad=HPAD, gpad=GPAD)
    out = jax.block_until_ready(out)

    assert out.shape == (num_graphs,), out.shape
    assert bool(jnp.all(jnp.isfinite(out)))
    print("KERNEL_OK")
</pallas_src>

<mosaic_0001>
module attributes {stable_mosaic.version = 11 : i64} {
  func.func @project_kernel(%arg0: i32, %arg1: memref<128x128xbf16, #tpu.memory_space<vmem>>, %arg2: memref<128x128xbf16, #tpu.memory_space<vmem>>, %arg3: memref<128x128xbf16, #tpu.memory_space<vmem>>) attributes {dimension_semantics = [#tpu.dimension_semantics<parallel>], iteration_bounds = array<i64: 1>, scalar_prefetch = 0 : i64, scratch_operands = 0 : i64, tpu.core_type = #tpu.core_type<tc>, window_params = [{transform_indices = @transform_0, window_bounds = array<i64: 128, 128>}, {pipeline_mode = #tpu.pipeline_mode<synchronous>, transform_indices = @transform_1, window_bounds = array<i64: 128, 128>}, {transform_indices = @transform_2, window_bounds = array<i64: 128, 128>}]} {
    %c0 = arith.constant 0 : index
    %c0_0 = arith.constant 0 : index
    %0 = vector.load %arg1[%c0, %c0_0] : memref<128x128xbf16, #tpu.memory_space<vmem>>, vector<128x128xbf16>
    %c0_1 = arith.constant 0 : index
    %c0_2 = arith.constant 0 : index
    %1 = vector.load %arg2[%c0_1, %c0_2] : memref<128x128xbf16, #tpu.memory_space<vmem>>, vector<128x128xbf16>
    %cst = arith.constant dense<0.000000e+00> : vector<128x128xf32>
    %2 = tpu.matmul %0, %1, %cst {dimension_numbers = #tpu.dot_dimension_numbers<[1], [0], [0], [1], [0, 0, 1, 1], [], []>} : vector<128x128xbf16>, vector<128x128xbf16>, vector<128x128xf32> -> vector<128x128xf32>
    %3 = arith.truncf %2 : vector<128x128xf32> to vector<128x128xbf16>
    %c0_3 = arith.constant 0 : index
    %c0_4 = arith.constant 0 : index
    %4 = vector.load %arg3[%c0_3, %c0_4] : memref<128x128xbf16, #tpu.memory_space<vmem>>, vector<128x128xbf16>
    tpu.vector_store %arg3[%c0_3, %c0_4], %3 {strides = array<i32>} : memref<128x128xbf16, #tpu.memory_space<vmem>>, vector<128x128xbf16>,
    return
  }
  func.func @transform_0(%arg0: i32) -> (i32, i32) {
    %c0_i32 = arith.constant 0 : i32
    %c0_i32_0 = arith.constant 0 : i32
    return %arg0, %c0_i32 : i32, i32
  }
  func.func @transform_1(%arg0: i32) -> (i32, i32) {
    %c0_i32 = arith.constant 0 : i32
    %c0_i32_0 = arith.constant 0 : i32
    %c0_i32_1 = arith.constant 0 : i32
    return %c0_i32, %c0_i32_0 : i32, i32
  }
  func.func @transform_2(%arg0: i32) -> (i32, i32) {
    %c0_i32 = arith.constant 0 : i32
    %c0_i32_0 = arith.constant 0 : i32
    return %arg0, %c0_i32 : i32, i32
  }
}

</mosaic_0001>

<bundles_post_ra>
// kernel: tpu_custom_call.1
= control target key start
LH: loop header
LB: loop body
LE: loop exit
PB: predicated region body
PF: predicated region fallthrough
CT: control target
= control target key end

     0   :  { %7 = vsyncpa [#allocation3], 0  ;;  %s648_s0 = inlined_call_operand.hbm [shape: bf16[128,128], index: 0, kind: input, shape index: {}]   ;;  %s649_s1 = inlined_call_operand.hbm [shape: bf16[128,128], index: 1, kind: input, shape index: {}]   ;;  %s650_s2 = inlined_call_operand.hbm [shape: bf16[128,128], index: 2, kind: output, shape index: {}]  }
   0x1   :  { %8 = vsyncpa [#allocation6], 0 }
   0x2   :  { %9 = vsyncpa [#allocation4], 0  ;;  %s610_s9 = smov [#allocation2]  }
   0x3   :  { %s15_s10 = sshll.u32 %s610_s9, 4  ;;  %s16_s10 = int_to_ptr.vmem [resolvable:$true] %s15_s10 }
   0x4   :  { %s552_s11 = scalar_lea.vmem %s16_s10, 1024  ;;  %p557_p1 = scmp.lt.s32.totalorder %s16_s10, %s16_s10 }
   0x5   :  { %p553_p0 = scmp.ne.s32.totalorder %s16_s10, %s552_s11  ;;  %p558_p2 = scmp.lt.s32.totalorder %s552_s11, %s552_s11 }
   0x7   :  { %p559_p3 = por %p558_p2, %p557_p1 }
   0x9   :  { %p560_p4 = pnand %p559_p3, %p553_p0 }
   0xb   :  { %563 = shalt.err (!%p560_p4)
}
   0xc   :  { %s611_s12 = smov 64   ;;  %s612_s13 = smov 4  }
   0xd   :  { %21 = dma.hbm_to_vmem [thread:$0]  %s648_s0, 1024, %s16_s10, [#allocation3], %s611_s12, %s611_s12, %s612_s13  }
   0xe   :  { %s613_s16 = smov [#allocation5]  }
   0xf   :  { %s27_s17 = sshll.u32 %s613_s16, 4  ;;  %s28_s17 = int_to_ptr.vmem [resolvable:$true] %s27_s17 }
  0x10   :  { %s572_s18 = scalar_lea.vmem %s28_s17, 1024  ;;  %p577_p6 = scmp.lt.s32.totalorder %s28_s17, %s28_s17 }
  0x11   :  { %p573_p5 = scmp.ne.s32.totalorder %s28_s17, %s572_s18  ;;  %p578_p7 = scmp.lt.s32.totalorder %s572_s18, %s572_s18 }
  0x13   :  { %p579_p8 = por %p578_p7, %p577_p6 }
  0x15   :  { %p580_p9 = pnand %p579_p8, %p573_p5 }
  0x17   :  { %583 = shalt.err (!%p580_p9)
}
  0x18   :  { %33 = dma.hbm_to_vmem [thread:$0]  %s649_s1, 1024, %s28_s17, [#allocation6], %s611_s12, %s611_s12, %s612_s13  }
  0x19   :  { %604 = dma.done.wait [#allocation3], 1024  }
  0x1a   :  { %605 = vsyncadd [#allocation3], 4294966272 }
  0x1b   :  { %606 = dma.done.wait [#allocation6], 1024  }
  0x1c   :  { %607 = vsyncadd [#allocation6], 4294966272  ;;  %v528_v0 = vld [vmem:[#allocation5 + $0x38] sm:$0xff]   ;;  %v529_v1 = vld [vmem:[#allocation5 + $0x30] sm:$0xff]   ;;  %s614_s0 = smov [#allocation7]  }
  0x1d   :  { %475 = vmatprep.subr.bf16.mxu0 %v528_v0  ;;  %507 = vmatprep.subr.bf16.mxu1 %v528_v0  ;;  %v530_v2 = vld [vmem:[#allocation5 + $0x28] sm:$0xff]   ;;  %v531_v3 = vld [vmem:[#allocation5 + $0x20] sm:$0xff]   ;;  %v532_v6 = vld [vmem:[#allocation5 + $0x18] sm:$0xff]   ;;  %s351_s1 = sshll.u32 %s614_s0, 4  ;;  %s352_s1 = int_to_ptr.vmem [resolvable:$true] %s351_s1 }
  0x1e   :  { %476 = vmatpush3.bf16.msra.mxu0 %v528_v0  ;;  %515 = vmatpush3.bf16.msra.mxu1 %v528_v0  ;;  %v536_v4 = vld [vmem:[#allocation2] sm:$0xff]   ;;  %v533_v7 = vld [vmem:[#allocation5 + $0x10] sm:$0xff]   ;;  %v534_v8 = vld [vmem:[#allocation5 + $0x8] sm:$0xff]   ;;  %s584_s21 = scalar_lea.vmem %s352_s1, 1024  ;;  %p589_p11 = scmp.lt.s32.totalorder %s352_s1, %s352_s1 }
  0x1f   :  { %477 = vmatprep.subr.bf16.mxu0 %v529_v1  ;;  %508 = vmatprep.subr.bf16.mxu1 %v529_v1  ;;  %v537_v5 = vld [vmem:[#allocation2 + $0x20] sm:$0xff]   ;;  %v538_v10 = vld [vmem:[#allocation2 + $0x8] sm:$0xff]   ;;  %v540_v12 = vld [vmem:[#allocation2 + $0x10] sm:$0xff]   ;;  %p585_p10 = scmp.ne.s32.totalorder %s352_s1, %s584_s21  ;;  %p590_p12 = scmp.lt.s32.totalorder %s584_s21, %s584_s21 }
  0x20   :  { %491 = vmatprep.mubr.bf16.mxu0 %v536_v4  ;;  %499 = vmatprep.mubr.bf16.mxu1 %v537_v5  ;;  %v535_v9 = vld [vmem:[#allocation5] sm:$0xff]   ;;  %v539_v11 = vld [vmem:[#allocation2 + $0x28] sm:$0xff]   ;;  %v541_v13 = vld [vmem:[#allocation2 + $0x30] sm:$0xff]  }
  0x21   :  { %v542_v14 = vld [vmem:[#allocation2 + $0x18] sm:$0xff]   ;;  %p591_p13 = por %p590_p12, %p589_p11 }
  0x22   :  { %478 = vmatpush3.bf16.msra.mxu0 %v529_v1  ;;  %516 = vmatpush3.bf16.msra.mxu1 %v529_v1  ;;  %v543_v15 = vld [vmem:[#allocation2 + $0x38] sm:$0xff]  }
  0x23   :  { %479 = vmatprep.subr.bf16.mxu0 %v530_v2  ;;  %509 = vmatprep.subr.bf16.mxu1 %v530_v2  ;;  %p592_p0 = pnand %p591_p13, %p585_p10 }
  0x26   :  { %480 = vmatpush3.bf16.msra.mxu0 %v530_v2  ;;  %517 = vmatpush3.bf16.msra.mxu1 %v530_v2 }
  0x27   :  { %481 = vmatprep.subr.bf16.mxu0 %v531_v3  ;;  %510 = vmatprep.subr.bf16.mxu1 %v531_v3 }
  0x2a   :  { %482 = vmatpush3.bf16.msra.mxu0 %v531_v3  ;;  %518 = vmatpush3.bf16.msra.mxu1 %v531_v3 }
  0x2b   :  { %483 = vmatprep.subr.bf16.mxu0 %v532_v6  ;;  %511 = vmatprep.subr.bf16.mxu1 %v532_v6 }
  0x2e   :  { %484 = vmatpush3.bf16.msra.mxu0 %v532_v6  ;;  %519 = vmatpush3.bf16.msra.mxu1 %v532_v6 }
  0x2f   :  { %485 = vmatprep.subr.bf16.mxu0 %v533_v7  ;;  %512 = vmatprep.subr.bf16.mxu1 %v533_v7 }
  0x32   :  { %486 = vmatpush3.bf16.msra.mxu0 %v533_v7  ;;  %520 = vmatpush3.bf16.msra.mxu1 %v533_v7 }
  0x33   :  { %487 = vmatprep.subr.bf16.mxu0 %v534_v8  ;;  %513 = vmatprep.subr.bf16.mxu1 %v534_v8 }
  0x36   :  { %488 = vmatpush3.bf16.msra.mxu0 %v534_v8  ;;  %521 = vmatpush3.bf16.msra.mxu1 %v534_v8 }
  0x37   :  { %489 = vmatprep.subr.bf16.mxu0 %v535_v9  ;;  %514 = vmatprep.subr.bf16.mxu1 %v535_v9 }
  0x3a   :  { %490 = vmatpush3.bf16.msra.mxu0 %v535_v9  ;;  %522 = vmatpush3.bf16.msra.mxu1 %v535_v9 }
  0x3d   :  { %492 = vmatmul.mubr.bf16.vlgmr.msra.gmra.mxu0 %v538_v10  ;;  %500 = vmatmul.mubr.bf16.vlgmr.msra.gmra.mxu1 %v539_v11 }
  0x3e   :  { %495 = vmatprep.mubr.bf16.mxu0 %v540_v12  ;;  %503 = vmatprep.mubr.bf16.mxu1 %v541_v13 }
  0x45   :  { %496 = vmatmul.mubr.bf16.gmra.mxu0 %v542_v14  ;;  %504 = vmatmul.mubr.bf16.gmra.mxu1 %v543_v15 }
  0xfd   :  { %v493_v16 = vpop.f32.mrf.mxu0  ;;  %v501_v17 = vpop.f32.mrf.mxu1 }
  0xff   :  { %v203_v18 = vpop.f32.mrf.mxu0  ;;  %v235_v19 = vpop.f32.mrf.mxu1 }
 0x101   :  { %v494_v20 = vpop.f32.mrf.mxu0  ;;  %v502_v21 = vpop.f32.mrf.mxu1 }
 0x102   :  { %v420_v22 = vpack.c.bf16 %v494_v20, %v493_v16  ;;  %v440_v23 = vpack.c.bf16 %v502_v21, %v501_v17 }
 0x103   :  { %v206_v24 = vpop.f32.mrf.mxu0  ;;  %v238_v25 = vpop.f32.mrf.mxu1 }
 0x104   :  { %452 = vst [vmem:[#allocation7 + $0x8] sm:$0xff] %v420_v22   ;;  %456 = vst [vmem:[#allocation7 + $0x28] sm:$0xff] %v440_v23   ;;  %v415_v26 = vpack.c.bf16 %v206_v24, %v203_v18  ;;  %v435_v27 = vpack.c.bf16 %v238_v25, %v235_v19 }
 0x105   :  { %v497_v28 = vpop.f32.mrf.mxu0  ;;  %v505_v29 = vpop.f32.mrf.mxu1 }
 0x106   :  { %416 = vst [vmem:[#allocation7] sm:$0xff] %v415_v26   ;;  %455 = vst [vmem:[#allocation7 + $0x20] sm:$0xff] %v435_v27  }
 0x107   :  { %v219_v30 = vpop.f32.mrf.mxu0  ;;  %v251_v31 = vpop.f32.mrf.mxu1 }
 0x109   :  { %v498_v32 = vpop.f32.mrf.mxu0  ;;  %v506_v33 = vpop.f32.mrf.mxu1 }
 0x10a   :  { %v430_v34 = vpack.c.bf16 %v498_v32, %v497_v28  ;;  %v450_v35 = vpack.c.bf16 %v506_v33, %v505_v29 }
 0x10b   :  { %v222_v36 = vpop.f32.mrf.mxu0  ;;  %v254_v37 = vpop.f32.mrf.mxu1 }
 0x10c   :  { %454 = vst [vmem:[#allocation7 + $0x18] sm:$0xff] %v430_v34   ;;  %458 = vst [vmem:[#allocation7 + $0x38] sm:$0xff] %v450_v35   ;;  %v425_v38 = vpack.c.bf16 %v222_v36, %v219_v30  ;;  %v445_v39 = vpack.c.bf16 %v254_v37, %v251_v31 }
 0x10e   :  { %453 = vst [vmem:[#allocation7 + $0x10] sm:$0xff] %v425_v38   ;;  %457 = vst [vmem:[#allocation7 + $0x30] sm:$0xff] %v445_v39  }
 0x10f   :  { %595 = shalt.err (!%p592_p0)
}
 0x110   :  { %357 = dma.vmem_to_hbm [thread:$0]  %s352_s1, 1024, %s650_s2, [#allocation4], %s611_s12, %s611_s12, %s612_s13  }
 0x111   :  { %608 = dma.done.wait [#allocation4], 1024  }
 0x112   :  { %609 = vsyncadd [#allocation4], 4294966272 }
 0x113   :  { %361 = vsyncpa [#allocation3], 1 }
 0x114   :  { %362 = vsyncpa [#allocation6], 1 }
 0x115   :  { %363 = vsyncpa [#allocation4], 1 }

</bundles_post_ra>
